<compile_context>
chip_gen: v6e
topology: v6e:2x2x1
jax: 0.10.0
libtpu: 0.0.40
codegen_flags: <defaults>
</compile_context>

<pallas_src>
import functools

import jax
import jax.numpy as jnp
from jax.experimental import pallas as pl
from jax.experimental.pallas import tpu as pltpu

LEAKY_SLOPE = 0.01   # F.leaky_relu default
GAT_SLOPE = 0.2      # GAT attention LeakyReLU slope
BN_EPS = 1e-5
_NEG_BIG = -1e30


def _rup(x, m):
    return ((x + m - 1) // m) * m


def _bn(y, act='none'):
    """Training-mode BatchNorm1d (gamma=1, beta=0) over axis 0, f32 math."""
    mean = jnp.mean(y, axis=0, keepdims=True)
    var = jnp.mean((y - mean) ** 2, axis=0, keepdims=True)
    y = (y - mean) * jax.lax.rsqrt(var + BN_EPS)
    if act == 'leaky_relu':
        y = jnp.where(y > 0, y, LEAKY_SLOPE * y)
    return y


def _mm_epilogue(y, act):
    if act == 'relu':
        return jnp.maximum(y, 0.0)
    if act == 'tanh':
        return jnp.tanh(y)
    if act == 'leaky_relu':
        return jnp.where(y > 0, y, LEAKY_SLOPE * y)
    return y


# ------------------- fused matmul + bias + activation ------------------------
def _mm_kernel(x_ref, w_ref, b_ref, o_ref, *, act):
    # bf16 operands on the MXU, f32 accumulation, f32 epilogue.
    y = jnp.dot(x_ref[...], w_ref[...], preferred_element_type=jnp.float32)
    y = y + b_ref[...]
    o_ref[...] = _mm_epilogue(y, act).astype(o_ref.dtype)


def linear(x, w, b, act='none', out_dtype=jnp.float32, tm_big=512):
    """act(x @ w + b).  x:[M,K], w:[K,N], b:[N].

    - operands cast to bf16, f32 accumulation
    - K and N are one full block each (no K grid axis, no padding copies)
    - M is a single full block when small; tiled by `tm_big` ('parallel' grid
      axis -> megacore sharding) for the big im2col matmul.
    """
    M, K = x.shape
    _, N = w.shape
    xb = x.astype(jnp.bfloat16)
    wb = w.astype(jnp.bfloat16)
    b2 = b.reshape(1, N).astype(jnp.float32)

    if M <= 2048:
        tm, Mp = M, M
    else:
        tm = tm_big
        Mp = _rup(M, tm)
        if Mp != M:                      # fallback only; hot paths are exact multiples
            xb = jnp.pad(xb, ((0, Mp - M), (0, 0)))

    out = pl.pallas_call(
        functools.partial(_mm_kernel, act=act),
        out_shape=jax.ShapeDtypeStruct((Mp, N), out_dtype),
        grid_spec=pltpu.PrefetchScalarGridSpec(
            num_scalar_prefetch=0,
            grid=(Mp // tm,),
            in_specs=[
                pl.BlockSpec((tm, K), lambda i: (i, 0)),
                pl.BlockSpec((K, N), lambda i: (0, 0)),
                pl.BlockSpec((1, N), lambda i: (0, 0)),
            ],
            out_specs=pl.BlockSpec((tm, N), lambda i: (i, 0)),
        ),
        compiler_params=pltpu.CompilerParams(
            dimension_semantics=("parallel",),
            vmem_limit_bytes=32 * 1024 * 1024),
    )(xb, wb, b2)
    return out if Mp == M else out[:M]


# -------------- fused GAT layer: projection + attention + BN + leaky ----------
def _gat_layer_kernel(x_ref, w_ref, asrc_ref, adst_ref, adj_ref, o_ref,
                      *, heads, out_dim):
    # projection on the MXU (bf16 operands, f32 accumulation)
    h = jnp.dot(x_ref[...].astype(jnp.bfloat16),
                w_ref[...].astype(jnp.bfloat16),
                preferred_element_type=jnp.float32)            # (N, H*F)
    adj = adj_ref[...]
    a_src = asrc_ref[...]
    a_dst = adst_ref[...]
    dn = (((1,), (1,)), ((), ()))
    for hd in range(heads):
        lo = hd * out_dim
        hh = h[:, lo:lo + out_dim]                             # (N, F)
        a_s = a_src[hd:hd + 1, :]                              # (1, F)
        a_d = a_dst[hd:hd + 1, :]                              # (1, F)
        # destination score as a lane-reduction, source score as a (1,N) row
        s_dst = jnp.sum(hh * a_d, axis=-1, keepdims=True)      # (N, 1)
        s_src = jax.lax.dot_general(a_s, hh, dn,
                                    preferred_element_type=jnp.float32)  # (1, N)
        e = s_dst + s_src
        e = jnp.where(e > 0, e, GAT_SLOPE * e)
        e = jnp.where(adj > 0, e, _NEG_BIG)
        e = e - jnp.max(e, axis=1, keepdims=True)
        p = jnp.exp(e)
        alpha = p / jnp.sum(p, axis=1, keepdims=True)
        y = jnp.dot(alpha, hh, preferred_element_type=jnp.float32)       # (N, F)
        # BatchNorm1d is per-feature, so BN(concat(heads)) == concat(BN(head));
        # write each head's normalized + leaky output straight into its lanes.
        o_ref[:, pl.ds(lo, out_dim)] = _bn(y, act='leaky_relu')


def gat_layer(x, adj, params):
    # TODO(synk): SGGATConv source is not provided; standard GAT-style attention
    #             (dense adjacency with self-loops, concat heads) is implemented,
    #             fused with the following BatchNorm1d + leaky_relu.
    W, a_src, a_dst = params['W'], params['a_src'], params['a_dst']
    heads, out_dim = params['heads'], params['out_dim']
    N, Fin = x.shape
    HF = heads * out_dim
    return pl.pallas_call(
        functools.partial(_gat_layer_kernel, heads=heads, out_dim=out_dim),
        out_shape=jax.ShapeDtypeStruct((N, HF), jnp.float32),
        grid_spec=pltpu.PrefetchScalarGridSpec(
            num_scalar_prefetch=0, grid=(1,),
            in_specs=[
                pl.BlockSpec((N, Fin), lambda i: (0, 0)),
                pl.BlockSpec((Fin, HF), lambda i: (0, 0)),
                pl.BlockSpec((heads, out_dim), lambda i: (0, 0)),
                pl.BlockSpec((heads, out_dim), lambda i: (0, 0)),
                pl.BlockSpec((N, N), lambda i: (0, 0)),
            ],
            out_specs=pl.BlockSpec((N, HF), lambda i: (0, 0))),
        compiler_params=pltpu.CompilerParams(
            dimension_semantics=("arbitrary",)),
    )(x.astype(jnp.float32), W, a_src, a_dst, adj)


# --------- fused cell-line tail: fc_mut + gexpr + methy + fcat + gmp + BN -----
def _tail_kernel(ib_ref, xn_ref, mut_ref, gex_ref, met_ref,
                 wmu_ref, bmu_ref,
                 wg1_ref, bg1_ref, wg2_ref, bg2_ref,
                 wm1_ref, bm1_ref, wm2_ref, bm2_ref,
                 wc0_ref, wc1_ref, wc2_ref, bc_ref,
                 o_ref, *, num_graphs, output):
    def mm(a, w):                                      # bf16 operands, f32 acc
        return jnp.dot(a.astype(jnp.bfloat16), w.astype(jnp.bfloat16),
                       preferred_element_type=jnp.float32)

    # mutation: relu(fc_mut)
    xm = jnp.maximum(mm(mut_ref[...], wmu_ref[...]) + bmu_ref[...], 0.0)
    # gene expression: BN(tanh(fc_gexp1)) -> relu(fc_gexp2)
    xg = _bn(jnp.tanh(mm(gex_ref[...], wg1_ref[...]) + bg1_ref[...]))
    xg = jnp.maximum(mm(xg, wg2_ref[...]) + bg2_ref[...], 0.0)
    # methylation: BN(tanh(fc_methy1)) -> relu(fc_methy2)
    xe = _bn(jnp.tanh(mm(met_ref[...], wm1_ref[...]) + bm1_ref[...]))
    xe = jnp.maximum(mm(xe, wm2_ref[...]) + bm2_ref[...], 0.0)
    # fcat(concat(mut, gexpr, methy)) == mut@W0 + gexpr@W1 + methy@W2 (+b), relu
    xcell = (mm(xm, wc0_ref[...]) + mm(xg, wc1_ref[...]) +
             mm(xe, wc2_ref[...]) + bc_ref[...])
    xcell = jnp.maximum(xcell, 0.0)

    # TODO(synk): the reference module applies nn.BatchNorm1d(output) to a
    # 2*output-wide tensor (shape bug in the original); with default affine params
    # (gamma=1, beta=0) BN is pure normalization, applied here per feature over the
    # actual 2*output columns.  BN is per-feature -> the two halves are independent.
    o_ref[:, pl.ds(0, output)] = _bn(xcell)

    # drug branch: global max pool over graph ids, then BN of that half
    xn = xn_ref[...]                                   # (N_nodes, output) f32
    ib = ib_ref[...]                                   # (N_nodes, 1) int32
    rows = [jnp.max(jnp.where(ib == g, xn, _NEG_BIG), axis=0, keepdims=True)
            for g in range(num_graphs)]
    mean_d = sum(rows) / num_graphs
    var_d = sum([(r - mean_d) ** 2 for r in rows]) / num_graphs
    inv_d = jax.lax.rsqrt(var_d + BN_EPS)
    for g in range(num_graphs):
        o_ref[pl.ds(g, 1), pl.ds(output, output)] = (rows[g] - mean_d) * inv_d


def cell_tail(x_nodes, ibatch, mut_flat, gexpr, methy, params, num_graphs):
    N, out_dim = x_nodes.shape
    B = mut_flat.shape[0]
    assert B == num_graphs, "cell-line batch must equal number of drug graphs"
    p = params
    wc = p['fcat']['W']
    assert wc.shape[0] == 3 * out_dim
    ib2 = ibatch.astype(jnp.int32).reshape(N, 1)
    args = [
        ib2, x_nodes.astype(jnp.float32),
        mut_flat.astype(jnp.float32), gexpr.astype(jnp.float32),
        methy.astype(jnp.float32),
        p['fc_mut']['W'], p['fc_mut']['b'].reshape(1, -1),
        p['fc_gexp1']['W'], p['fc_gexp1']['b'].reshape(1, -1),
        p['fc_gexp2']['W'], p['fc_gexp2']['b'].reshape(1, -1),
        p['fc_methy1']['W'], p['fc_methy1']['b'].reshape(1, -1),
        p['fc_methy2']['W'], p['fc_methy2']['b'].reshape(1, -1),
        wc[0:out_dim], wc[out_dim:2 * out_dim], wc[2 * out_dim:3 * out_dim],
        p['fcat']['b'].reshape(1, -1),
    ]
    in_specs = [pl.BlockSpec(a.shape, lambda i: (0, 0)) for a in args]
    return pl.pallas_call(
        functools.partial(_tail_kernel, num_graphs=num_graphs, output=out_dim),
        out_shape=jax.ShapeDtypeStruct((num_graphs, 2 * out_dim), jnp.float32),
        grid_spec=pltpu.PrefetchScalarGridSpec(
            num_scalar_prefetch=0, grid=(1,),
            in_specs=in_specs,
            out_specs=pl.BlockSpec((num_graphs, 2 * out_dim), lambda i: (0, 0))),
        compiler_params=pltpu.CompilerParams(
            dimension_semantics=("arbitrary",)),
    )(*args)


# -------------------------------- parameters ----------------------------------
def xavier_uniform(key, fan_in, fan_out, shape):
    limit = (6.0 / (fan_in + fan_out)) ** 0.5
    return jax.random.uniform(key, shape, jnp.float32, -limit, limit)


def init_params(key, gcn_layer, dim_gexp, dim_methy, output, units_list, heads):
    keys = iter(jax.random.split(key, 64))
    p = {}

    def gat_params(in_dim, out_dim, h):
        return dict(
            W=xavier_uniform(next(keys), in_dim, h * out_dim, (in_dim, h * out_dim)),
            a_src=xavier_uniform(next(keys), out_dim, 1, (h, out_dim)),
            a_dst=xavier_uniform(next(keys), out_dim, 1, (h, out_dim)),
            heads=h, out_dim=out_dim)

    def lin(in_d, out_d):
        return dict(W=xavier_uniform(next(keys), in_d, out_d, (in_d, out_d)),
                    b=jnp.zeros((out_d,), jnp.float32))

    p['conv1'] = gat_params(gcn_layer, units_list[0], heads)
    p['graph_conv'] = [gat_params(units_list[i] * heads, units_list[i + 1], heads)
                       for i in range(len(units_list) - 1)]
    p['conv_end'] = gat_params(units_list[-1] * heads, output, 1)
    p['fc_gexp1'] = lin(dim_gexp, 256)
    p['fc_gexp2'] = lin(256, output)
    p['fc_methy1'] = lin(dim_methy, 256)
    p['fc_methy2'] = lin(256, output)
    p['fc_mut'] = lin(2010, output)
    p['fcat'] = lin(300, output)
    # conv_mut1: torch weight [50, 1, 1, 700]  -> stored as [700, 50]
    p['conv_mut1'] = dict(W=xavier_uniform(next(keys), 700, 50 * 700, (700, 50)),
                          b=jnp.zeros((50,), jnp.float32))
    # conv_mut2: torch weight [30, 50, 1, 5]   -> stored as [250, 30] (c-major, kw-minor)
    p['conv_mut2'] = dict(W=xavier_uniform(next(keys), 250, 150, (250, 30)),
                          b=jnp.zeros((30,), jnp.float32))
    return p


# ---------------------------------- forward -----------------------------------
def node_representation_forward(params, drug_feature, drug_adj, ibatch,
                                mutation_data, gexpr_data, methylation_data,
                                num_graphs):
    # ----- drug graph branch: one fused kernel per (GAT conv + BN + leaky_relu) -----
    x = gat_layer(drug_feature, drug_adj, params['conv1'])
    for gp in params['graph_conv']:
        x = gat_layer(x, drug_adj, gp)
    x = gat_layer(x, drug_adj, params['conv_end'])                 # [N_nodes, output]

    # ----- mutation branch: Conv2d(1,700,stride5)->tanh->pool5->Conv2d(5,stride2)->
    #       relu->pool10->flatten->fc_mut (fc_mut is fused into the tail kernel) -----
    B = mutation_data.shape[0]
    Wm = mutation_data.shape[-1]
    xm = mutation_data.reshape(B, Wm).astype(jnp.bfloat16)

    KW1, ST1 = 700, 5
    w1out = (Wm - KW1) // ST1 + 1
    p1w = w1out // 5
    # Phase decomposition (gather-free im2col): window w = 140*q + r reads the
    # contiguous chunk x[700*q + 5*r : +700]; for fixed r the chunks tile x exactly,
    # so the patch matrix is built from 140 contiguous slices + reshapes.
    PH = KW1 // ST1                      # 140 phases
    nq = -(-w1out // PH)                 # chunks per phase (padded)
    need = ST1 * (PH - 1) + KW1 * nq
    xpad = jnp.pad(xm, ((0, 0), (0, max(0, need - Wm))))
    phases = [xpad[:, ST1 * r: ST1 * r + KW1 * nq].reshape(B, nq, KW1)
              for r in range(PH)]
    patches1 = jnp.stack(phases, axis=1).reshape(B * PH * nq, KW1)   # bf16, no gather
    y1 = linear(patches1, params['conv_mut1']['W'], params['conv_mut1']['b'],
                act='tanh', out_dtype=jnp.bfloat16, tm_big=2744)
    y1 = y1.reshape(B, PH, nq, 50)
    # F.max_pool2d(., (1,5)): each pool group is 5 consecutive phases of one q-chunk.
    y1 = y1.reshape(B, PH // 5, 5, nq, 50).max(axis=2)               # (B, 28, nq, 50)
    y1 = y1.transpose(0, 2, 1, 3).reshape(B, nq * (PH // 5), 50)[:, :p1w, :]

    # conv_mut2: kernel (1,5), stride (1,2) -> strided-slice im2col + Pallas matmul (+relu)
    KW2, ST2 = 5, 2
    w2out = (p1w - KW2) // ST2 + 1
    cols = [y1[:, k: k + ST2 * w2out: ST2, :] for k in range(KW2)]   # each (B, w2out, 50)
    patches2 = jnp.stack(cols, axis=3).reshape(B * w2out, 50 * KW2)  # c-major, kw-minor
    y2 = linear(patches2, params['conv_mut2']['W'], params['conv_mut2']['b'],
                act='relu').reshape(B, w2out, 30)
    # F.max_pool2d(., (1,10))
    p2w = w2out // 10
    y2 = y2[:, :p2w * 10, :].reshape(B, p2w, 10, 30).max(axis=2)     # (B, p2w, 30)
    # nn.Flatten on NCHW [B, 30, 1, p2w] -> channel-major flatten
    x_mut_flat = y2.transpose(0, 2, 1).reshape(B, 30 * p2w)          # (B, 2010)

    # ----- fused tail: fc_mut, gexpr MLP+BN, methy MLP+BN, fcat, gmp, final BN -----
    x_all = cell_tail(x, ibatch, x_mut_flat, gexpr_data, methylation_data,
                      params, num_graphs)
    return x_all


if __name__ == "__main__":
    key = jax.random.PRNGKey(0)
    gcn_layer = 16
    dim_gexp = 32
    dim_methy = 32
    output = 100           # fcat = Linear(300, output)  =>  3 * output == 300
    units_list = [32, 32, 32]
    heads = 2
    num_graphs = 2         # == cell-line batch so the final concat is valid
    nodes_per_graph = 16
    N = num_graphs * nodes_per_graph
    MUT_W = 34673          # implied by fc_mut in_features == 2010

    keys = jax.random.split(key, 8)
    drug_feature = jax.random.normal(keys[0], (N, gcn_layer), jnp.float32)
    # dense symmetric block-diagonal adjacency with self-loops
    adj_r = jax.random.uniform(keys[1], (N, N)) < 0.3
    adj_r = jnp.logical_or(adj_r, adj_r.T)
    graph_id = jnp.repeat(jnp.arange(num_graphs), nodes_per_graph)
    same_graph = graph_id[:, None] == graph_id[None, :]
    adj = jnp.logical_and(adj_r, same_graph)
    adj = jnp.logical_or(adj, jnp.eye(N, dtype=bool)).astype(jnp.float32)
    ibatch = graph_id.astype(jnp.int32)
    mutation_data = (jax.random.uniform(keys[2], (num_graphs, 1, 1, MUT_W)) < 0.02
                     ).astype(jnp.float32)
    gexpr_data = jax.random.normal(keys[3], (num_graphs, dim_gexp), jnp.float32)
    methylation_data = jax.random.normal(keys[4], (num_graphs, dim_methy), jnp.float32)

    params = init_params(keys[5], gcn_layer, dim_gexp, dim_methy, output,
                         units_list, heads)

    out = node_representation_forward(params, drug_feature, adj, ibatch,
                                      mutation_data, gexpr_data, methylation_data,
                                      num_graphs)
    out = jax.block_until_ready(out)
    assert out.shape == (num_graphs, 2 * output)
    assert bool(jnp.all(jnp.isfinite(out)))
    print("KERNEL_OK")
</pallas_src>

<mosaic_0001>
module attributes {stable_mosaic.version = 11 : i64} {
  func.func @_gat_layer_kernel(%arg0: i32, %arg1: memref<32x16xf32, #tpu.memory_space<vmem>>, %arg2: memref<16x64xf32, #tpu.memory_space<vmem>>, %arg3: memref<2x32xf32, #tpu.memory_space<vmem>>, %arg4: memref<2x32xf32, #tpu.memory_space<vmem>>, %arg5: memref<32x32xf32, #tpu.memory_space<vmem>>, %arg6: memref<32x64xf32, #tpu.memory_space<vmem>>) attributes {dimension_semantics = [#tpu.dimension_semantics<arbitrary>], iteration_bounds = array<i64: 1>, scalar_prefetch = 0 : i64, scratch_operands = 0 : i64, tpu.core_type = #tpu.core_type<tc>, window_params = [{pipeline_mode = #tpu.pipeline_mode<synchronous>, transform_indices = @transform_0, window_bounds = array<i64: 32, 16>}, {pipeline_mode = #tpu.pipeline_mode<synchronous>, transform_indices = @transform_1, window_bounds = array<i64: 16, 64>}, {pipeline_mode = #tpu.pipeline_mode<synchronous>, transform_indices = @transform_2, window_bounds = array<i64: 2, 32>}, {pipeline_mode = #tpu.pipeline_mode<synchronous>, transform_indices = @transform_3, window_bounds = array<i64: 2, 32>}, {pipeline_mode = #tpu.pipeline_mode<synchronous>, transform_indices = @transform_4, window_bounds = array<i64: 32, 32>}, {pipeline_mode = #tpu.pipeline_mode<synchronous>, transform_indices = @transform_5, window_bounds = array<i64: 32, 64>}]} {
    %c0 = arith.constant 0 : index
    %c0_0 = arith.constant 0 : index
    %0 = vector.load %arg1[%c0, %c0_0] : memref<32x16xf32, #tpu.memory_space<vmem>>, vector<32x16xf32>
    %1 = arith.truncf %0 : vector<32x16xf32> to vector<32x16xbf16>
    %c0_1 = arith.constant 0 : index
    %c0_2 = arith.constant 0 : index
    %2 = vector.load %arg2[%c0_1, %c0_2] : memref<16x64xf32, #tpu.memory_space<vmem>>, vector<16x64xf32>
    %3 = arith.truncf %2 : vector<16x64xf32> to vector<16x64xbf16>
    %cst = arith.constant dense<0.000000e+00> : vector<32x64xf32>
    %4 = tpu.matmul %1, %3, %cst {dimension_numbers = #tpu.dot_dimension_numbers<[1], [0], [0], [1], [0, 0, 1, 1], [], []>} : vector<32x16xbf16>, vector<16x64xbf16>, vector<32x64xf32> -> vector<32x64xf32>
    %c0_3 = arith.constant 0 : index
    %c0_4 = arith.constant 0 : index
    %5 = vector.load %arg5[%c0_3, %c0_4] : memref<32x32xf32, #tpu.memory_space<vmem>>, vector<32x32xf32>
    %c0_5 = arith.constant 0 : index
    %c0_6 = arith.constant 0 : index
    %6 = vector.load %arg3[%c0_5, %c0_6] : memref<2x32xf32, #tpu.memory_space<vmem>>, vector<2x32xf32>
    %c0_7 = arith.constant 0 : index
    %c0_8 = arith.constant 0 : index
    %7 = vector.load %arg4[%c0_7, %c0_8] : memref<2x32xf32, #tpu.memory_space<vmem>>, vector<2x32xf32>
    %8 = vector.extract_strided_slice %4 {offsets = [0, 0], sizes = [32, 32], strides = [1, 1]} : vector<32x64xf32> to vector<32x32xf32>
    %9 = vector.extract_strided_slice %6 {offsets = [0, 0], sizes = [1, 32], strides = [1, 1]} : vector<2x32xf32> to vector<1x32xf32>
    %10 = vector.extract_strided_slice %7 {offsets = [0, 0], sizes = [1, 32], strides = [1, 1]} : vector<2x32xf32> to vector<1x32xf32>
    %11 = vector.broadcast %10 : vector<1x32xf32> to vector<32x32xf32>
    %12 = arith.mulf %8, %11 : vector<32x32xf32>
    %cst_9 = arith.constant dense<0.000000e+00> : vector<32xf32>
    %13 = vector.multi_reduction <add>, %12, %cst_9 [1] : vector<32x32xf32> to vector<32xf32>
    %14 = vector.shape_cast %13 : vector<32xf32> to vector<32x1xf32>
    %cst_10 = arith.constant dense<0.000000e+00> : vector<1x32xf32>
    %15 = tpu.matmul %9, %8, %cst_10 {dimension_numbers = #tpu.dot_dimension_numbers<[1], [1], [0], [0], [0, 0, 1, 0], [], []>} : vector<1x32xf32>, vector<32x32xf32>, vector<1x32xf32> -> vector<1x32xf32>
    %16 = vector.broadcast %14 : vector<32x1xf32> to vector<32x32xf32>
    %17 = vector.broadcast %15 : vector<1x32xf32> to vector<32x32xf32>
    %18 = arith.addf %16, %17 : vector<32x32xf32>
    %cst_11 = arith.constant 0.000000e+00 : f32
    %19 = vector.broadcast %cst_11 : f32 to vector<32x32xf32>
    %20 = arith.cmpf ogt, %18, %19 : vector<32x32xf32>
    %cst_12 = arith.constant 2.000000e-01 : f32
    %21 = vector.broadcast %cst_12 : f32 to vector<32x32xf32>
    %22 = arith.mulf %21, %18 : vector<32x32xf32>
    %23 = arith.select %20, %18, %22 : vector<32x32xi1>, vector<32x32xf32>
    %cst_13 = arith.constant 0.000000e+00 : f32
    %24 = vector.broadcast %cst_13 : f32 to vector<32x32xf32>
    %25 = arith.cmpf ogt, %5, %24 : vector<32x32xf32>
    %cst_14 = arith.constant -1.000000e+30 : f32
    %26 = vector.broadcast %cst_14 : f32 to vector<32x32xf32>
    %27 = arith.select %25, %23, %26 : vector<32x32xi1>, vector<32x32xf32>
    %cst_15 = arith.constant dense<0xFF800000> : vector<32xf32>
    %28 = vector.multi_reduction <maximumf>, %27, %cst_15 [1] : vector<32x32xf32> to vector<32xf32>
    %29 = vector.shape_cast %28 : vector<32xf32> to vector<32x1xf32>
    %30 = vector.broadcast %29 : vector<32x1xf32> to vector<32x32xf32>
    %31 = arith.subf %27, %30 : vector<32x32xf32>
    %32 = math.exp %31 : vector<32x32xf32>
    %cst_16 = arith.constant dense<0.000000e+00> : vector<32xf32>
    %33 = vector.multi_reduction <add>, %32, %cst_16 [1] : vector<32x32xf32> to vector<32xf32>
    %34 = vector.shape_cast %33 : vector<32xf32> to vector<32x1xf32>
    %35 = vector.broadcast %34 : vector<32x1xf32> to vector<32x32xf32>
    %36 = arith.divf %32, %35 : vector<32x32xf32>
    %cst_17 = arith.constant dense<0.000000e+00> : vector<32x32xf32>
    %37 = tpu.matmul %36, %8, %cst_17 {dimension_numbers = #tpu.dot_dimension_numbers<[1], [0], [0], [1], [0, 0, 1, 1], [], []>} : vector<32x32xf32>, vector<32x32xf32>, vector<32x32xf32> -> vector<32x32xf32>
    %cst_18 = arith.constant dense<0.000000e+00> : vector<32xf32>
    %38 = vector.multi_reduction <add>, %37, %cst_18 [0] : vector<32x32xf32> to vector<32xf32>
    %39 = vector.shape_cast %38 : vector<32xf32> to vector<1x32xf32>
    %cst_19 = arith.constant 3.200000e+01 : f32
    %40 = vector.broadcast %cst_19 : f32 to vector<1x32xf32>
    %41 = arith.divf %39, %40 : vector<1x32xf32>
    %42 = vector.broadcast %41 : vector<1x32xf32> to vector<32x32xf32>
    %43 = arith.subf %37, %42 : vector<32x32xf32>
    %44 = arith.mulf %43, %43 : vector<32x32xf32>
    %cst_20 = arith.constant dense<0.000000e+00> : vector<32xf32>
    %45 = vector.multi_reduction <add>, %44, %cst_20 [0] : vector<32x32xf32> to vector<32xf32>
    %46 = vector.shape_cast %45 : vector<32xf32> to vector<1x32xf32>
    %cst_21 = arith.constant 3.200000e+01 : f32
    %47 = vector.broadcast %cst_21 : f32 to vector<1x32xf32>
    %48 = arith.divf %46, %47 : vector<1x32xf32>
    %49 = vector.broadcast %41 : vector<1x32xf32> to vector<32x32xf32>
    %50 = arith.subf %37, %49 : vector<32x32xf32>
    %cst_22 = arith.constant 9.99999974E-6 : f32
    %51 = vector.broadcast %cst_22 : f32 to vector<1x32xf32>
    %52 = arith.addf %48, %51 : vector<1x32xf32>
    %53 = math.rsqrt %52 : vector<1x32xf32>
    %54 = vector.broadcast %53 : vector<1x32xf32> to vector<32x32xf32>
    %55 = arith.mulf %50, %54 : vector<32x32xf32>
    %cst_23 = arith.constant 0.000000e+00 : f32
    %56 = vector.broadcast %cst_23 : f32 to vector<32x32xf32>
    %57 = arith.cmpf ogt, %55, %56 : vector<32x32xf32>
    %cst_24 = arith.constant 0.00999999977 : f32
    %58 = vector.broadcast %cst_24 : f32 to vector<32x32xf32>
    %59 = arith.mulf %58, %55 : vector<32x32xf32>
    %60 = arith.select %57, %55, %59 : vector<32x32xi1>, vector<32x32xf32>
    %c0_25 = arith.constant 0 : index
    %c0_26 = arith.constant 0 : index
    %61 = vector.load %arg6[%c0_25, %c0_26] : memref<32x64xf32, #tpu.memory_space<vmem>>, vector<32x32xf32>
    tpu.vector_store %arg6[%c0_25, %c0_26], %60 {strides = array<i32>} : memref<32x64xf32, #tpu.memory_space<vmem>>, vector<32x32xf32>,
    %62 = vector.extract_strided_slice %4 {offsets = [0, 32], sizes = [32, 32], strides = [1, 1]} : vector<32x64xf32> to vector<32x32xf32>
    %63 = vector.extract_strided_slice %6 {offsets = [1, 0], sizes = [1, 32], strides = [1, 1]} : vector<2x32xf32> to vector<1x32xf32>
    %64 = vector.extract_strided_slice %7 {offsets = [1, 0], sizes = [1, 32], strides = [1, 1]} : vector<2x32xf32> to vector<1x32xf32>
    %65 = vector.broadcast %64 : vector<1x32xf32> to vector<32x32xf32>
    %66 = arith.mulf %62, %65 : vector<32x32xf32>
    %cst_27 = arith.constant dense<0.000000e+00> : vector<32xf32>
    %67 = vector.multi_reduction <add>, %66, %cst_27 [1] : vector<32x32xf32> to vector<32xf32>
    %68 = vector.shape_cast %67 : vector<32xf32> to vector<32x1xf32>
    %cst_28 = arith.constant dense<0.000000e+00> : vector<1x32xf32>
    %69 = tpu.matmul %63, %62, %cst_28 {dimension_numbers = #tpu.dot_dimension_numbers<[1], [1], [0], [0], [0, 0, 1, 0], [], []>} : vector<1x32xf32>, vector<32x32xf32>, vector<1x32xf32> -> vector<1x32xf32>
    %70 = vector.broadcast %68 : vector<32x1xf32> to vector<32x32xf32>
    %71 = vector.broadcast %69 : vector<1x32xf32> to vector<32x32xf32>
    %72 = arith.addf %70, %71 : vector<32x32xf32>
    %cst_29 = arith.constant 0.000000e+00 : f32
    %73 = vector.broadcast %cst_29 : f32 to vector<32x32xf32>
    %74 = arith.cmpf ogt, %72, %73 : vector<32x32xf32>
    %cst_30 = arith.constant 2.000000e-01 : f32
    %75 = vector.broadcast %cst_30 : f32 to vector<32x32xf32>
    %76 = arith.mulf %75, %72 : vector<32x32xf32>
    %77 = arith.select %74, %72, %76 : vector<32x32xi1>, vector<32x32xf32>
    %cst_31 = arith.constant 0.000000e+00 : f32
    %78 = vector.broadcast %cst_31 : f32 to vector<32x32xf32>
    %79 = arith.cmpf ogt, %5, %78 : vector<32x32xf32>
    %cst_32 = arith.constant -1.000000e+30 : f32
    %80 = vector.broadcast %cst_32 : f32 to vector<32x32xf32>
    %81 = arith.select %79, %77, %80 : vector<32x32xi1>, vector<32x32xf32>
    %cst_33 = arith.constant dense<0xFF800000> : vector<32xf32>
    %82 = vector.multi_reduction <maximumf>, %81, %cst_33 [1] : vector<32x32xf32> to vector<32xf32>
    %83 = vector.shape_cast %82 : vector<32xf32> to vector<32x1xf32>
    %84 = vector.broadcast %83 : vector<32x1xf32> to vector<32x32xf32>
    %85 = arith.subf %81, %84 : vector<32x32xf32>
    %86 = math.exp %85 : vector<32x32xf32>
    %cst_34 = arith.constant dense<0.000000e+00> : vector<32xf32>
    %87 = vector.multi_reduction <add>, %86, %cst_34 [1] : vector<32x32xf32> to vector<32xf32>
    %88 = vector.shape_cast %87 : vector<32xf32> to vector<32x1xf32>
    %89 = vector.broadcast %88 : vector<32x1xf32> to vector<32x32xf32>
    %90 = arith.divf %86, %89 : vector<32x32xf32>
    %cst_35 = arith.constant dense<0.000000e+00> : vector<32x32xf32>
    %91 = tpu.matmul %90, %62, %cst_35 {dimension_numbers = #tpu.dot_dimension_numbers<[1], [0], [0], [1], [0, 0, 1, 1], [], []>} : vector<32x32xf32>, vector<32x32xf32>, vector<32x32xf32> -> vector<32x32xf32>
    %cst_36 = arith.constant dense<0.000000e+00> : vector<32xf32>
    %92 = vector.multi_reduction <add>, %91, %cst_36 [0] : vector<32x32xf32> to vector<32xf32>
    %93 = vector.shape_cast %92 : vector<32xf32> to vector<1x32xf32>
    %cst_37 = arith.constant 3.200000e+01 : f32
    %94 = vector.broadcast %cst_37 : f32 to vector<1x32xf32>
    %95 = arith.divf %93, %94 : vector<1x32xf32>
    %96 = vector.broadcast %95 : vector<1x32xf32> to vector<32x32xf32>
    %97 = arith.subf %91, %96 : vector<32x32xf32>
    %98 = arith.mulf %97, %97 : vector<32x32xf32>
    %cst_38 = arith.constant dense<0.000000e+00> : vector<32xf32>
    %99 = vector.multi_reduction <add>, %98, %cst_38 [0] : vector<32x32xf32> to vector<32xf32>
    %100 = vector.shape_cast %99 : vector<32xf32> to vector<1x32xf32>
    %cst_39 = arith.constant 3.200000e+01 : f32
    %101 = vector.broadcast %cst_39 : f32 to vector<1x32xf32>
    %102 = arith.divf %100, %101 : vector<1x32xf32>
    %103 = vector.broadcast %95 : vector<1x32xf32> to vector<32x32xf32>
    %104 = arith.subf %91, %103 : vector<32x32xf32>
    %cst_40 = arith.constant 9.99999974E-6 : f32
    %105 = vector.broadcast %cst_40 : f32 to vector<1x32xf32>
    %106 = arith.addf %102, %105 : vector<1x32xf32>
    %107 = math.rsqrt %106 : vector<1x32xf32>
    %108 = vector.broadcast %107 : vector<1x32xf32> to vector<32x32xf32>
    %109 = arith.mulf %104, %108 : vector<32x32xf32>
    %cst_41 = arith.constant 0.000000e+00 : f32
    %110 = vector.broadcast %cst_41 : f32 to vector<32x32xf32>
    %111 = arith.cmpf ogt, %109, %110 : vector<32x32xf32>
    %cst_42 = arith.constant 0.00999999977 : f32
    %112 = vector.broadcast %cst_42 : f32 to vector<32x32xf32>
    %113 = arith.mulf %112, %109 : vector<32x32xf32>
    %114 = arith.select %111, %109, %113 : vector<32x32xi1>, vector<32x32xf32>
    %c0_43 = arith.constant 0 : index
    %c32 = arith.constant 32 : index
    %115 = vector.load %arg6[%c0_43, %c32] : memref<32x64xf32, #tpu.memory_space<vmem>>, vector<32x32xf32>
    tpu.vector_store %arg6[%c0_43, %c32], %114 {strides = array<i32>} : memref<32x64xf32, #tpu.memory_space<vmem>>, vector<32x32xf32>,
    return
  }
  func.func @transform_0(%arg0: i32) -> (i32, i32) {
    %c0_i32 = arith.constant 0 : i32
    %c0_i32_0 = arith.constant 0 : i32
    %c0_i32_1 = arith.constant 0 : i32
    return %c0_i32, %c0_i32_0 : i32, i32
  }
  func.func @transform_1(%arg0: i32) -> (i32, i32) {
    %c0_i32 = arith.constant 0 : i32
    %c0_i32_0 = arith.constant 0 : i32
    %c0_i32_1 = arith.constant 0 : i32
    return %c0_i32, %c0_i32_0 : i32, i32
  }
  func.func @transform_2(%arg0: i32) -> (i32, i32) {
    %c0_i32 = arith.constant 0 : i32
    %c0_i32_0 = arith.constant 0 : i32
    %c0_i32_1 = arith.constant 0 : i32
    return %c0_i32, %c0_i32_0 : i32, i32
  }
  func.func @transform_3(%arg0: i32) -> (i32, i32) {
    %c0_i32 = arith.constant 0 : i32
    %c0_i32_0 = arith.constant 0 : i32
    %c0_i32_1 = arith.constant 0 : i32
    return %c0_i32, %c0_i32_0 : i32, i32
  }
  func.func @transform_4(%arg0: i32) -> (i32, i32) {
    %c0_i32 = arith.constant 0 : i32
    %c0_i32_0 = arith.constant 0 : i32
    %c0_i32_1 = arith.constant 0 : i32
    return %c0_i32, %c0_i32_0 : i32, i32
  }
  func.func @transform_5(%arg0: i32) -> (i32, i32) {
    %c0_i32 = arith.constant 0 : i32
    %c0_i32_0 = arith.constant 0 : i32
    %c0_i32_1 = arith.constant 0 : i32
    return %c0_i32, %c0_i32_0 : i32, i32
  }
}

</mosaic_0001>

<bundles_post_ra>
// kernel: tpu_custom_call.1
= control target key start
LH: loop header
LB: loop body
LE: loop exit
PB: predicated region body
PF: predicated region fallthrough
CT: control target
= control target key end

     0   :  { %vm31_vm0 = vcmask 130048   ;;  %s1242_s0 = inlined_call_operand.vmem [shape: f32[32,16], index: 0, kind: input, shape index: {}]   ;;  %s1243_s1 = inlined_call_operand.vmem [shape: f32[16,64], index: 1, kind: input, shape index: {}]   ;;  %s1244_s2 = inlined_call_operand.vmem [shape: f32[2,32], index: 2, kind: input, shape index: {}]   ;;  %s1245_s3 = inlined_call_operand.vmem [shape: f32[2,32], index: 3, kind: input, shape index: {}]   ;;  %s1246_s4 = inlined_call_operand.vmem [shape: f32[32,32], index: 4, kind: input, shape index: {}]   ;;  %s1247_s5 = inlined_call_operand.hbm [shape: f32[32,64], index: 5, kind: output, shape index: {}]  }
   0x1   :  { %v28_v0 = vld [vmem:[%s1243_s1] sm:$0xff]  ;;  %v29_v1 = vld [vmem:[%s1243_s1 + $0x8] sm:$0xff]  ;;  %v24_v5 = vld [vmem:[%s1242_s0 + $0x10] sm:$0xff] }
   0x2   :  { %v22_v2 = vld [vmem:[%s1242_s0] sm:$0xff]  ;;  %v30_v3 = vpack.c.bf16 %v29_v1, %v28_v0  ;;  %v23_v4 = vld [vmem:[%s1242_s0 + $0x8] sm:$0xff]  ;;  %v25_v6 = vld [vmem:[%s1242_s0 + $0x18] sm:$0xff] }
   0x3   :  { %v26_v7 = vpack.c.bf16 %v23_v4, %v22_v2 }
   0x4   :  { %10 = vsyncpa [#allocation3], 0  ;;  %865 = vmatprep.subr.bf16.mxu0 %v30_v3  ;;  %v27_v8 = vpack.c.bf16 %v25_v6, %v24_v5  ;;  %v986_v9 = vmov 0.0   ;;  %vm987_vm1 = vmmov 0   ;;  %v93_v10 = vlaneseq  ;;  %v1052_v13 = vld [vmem:[%s1245_s3] sm:$0x3] }
   0x5   :  { %866 = vmatpush3.bf16.msra.mxu0 %v30_v3  ;;  %867 = vmatprep.mubr.msk.bf16.mxu0 %vm31_vm0, %v26_v7  ;;  %vm101_vm2 = vcmask 261120   ;;  %v1095_v27 = vld [vmem:[%s1244_s2] sm:$0x3]  ;;  %v1108_v34 = vld [vmem:[%s1246_s4 + $0x8] sm:$0xff]  ;;  %v1115_v41 = vld [vmem:[%s1246_s4 + $0x10] sm:$0xff]  ;;  %s989_s13 = smov 32  }
   0x6   :  { %871 = vmatprep.subr.mxu1 %v986_v9  ;;  %879 = vmatprep.mubr.msk.f32.mxu1 %vm987_vm1, %v986_v9  ;;  %v1044_v11 = vshrl.u32 %v93_v10, 7  ;;  %v1103_v33 = vld [vmem:[%s1246_s4] sm:$0xff]  ;;  %vm220_vm4 = vcmp.gt.f32.partialorder %v1108_v34, 0.0  ;;  %v1120_v42 = vld [vmem:[%s1246_s4 + $0x18] sm:$0xff]  ;;  %vm221_vm9 = vcmp.gt.f32.partialorder %v1115_v41, 0.0  ;;  %s988_s4 = smov 96  }
   0x7   :  { %vm219_vm3 = vcmp.gt.f32.partialorder %v1103_v33, 0.0  ;;  %vm222_vm10 = vcmp.gt.f32.partialorder %v1120_v42, 0.0  ;;  %s990_s14 = smov [#allocation2]  }
   0x8   :  { %868 = vmatmul.mubr.msk.bf16.vlgmr.msra.gmra.mxu0 %vm31_vm0, %v27_v8  ;;  %v1047_v12 = vsub.s32 0, %v1044_v11  ;;  %s805_s15 = sshll.u32 %s990_s14, 4  ;;  %s806_s15 = int_to_ptr.vmem [resolvable:$true] %s805_s15 }
   0x9   :  { %s964_s16 = scalar_lea.vmem %s806_s15, 512  ;;  %p969_p1 = scmp.lt.s32.totalorder %s806_s15, %s806_s15 }
   0xa   :  { %v96_v14 = vrot.slane %v1052_v13, %v1047_v12  ;;  %p965_p0 = scmp.ne.s32.totalorder %s806_s15, %s964_s16  ;;  %p970_p2 = scmp.lt.s32.totalorder %s964_s16, %s964_s16 }
   0xc   :  { %p971_p3 = por %p970_p2, %p969_p1 }
   0xe   :  { %p972_p4 = pnand %p971_p3, %p965_p0 }
  0xc8   :  { %v1056_v15 = vpop.f32.mrf.mxu0 }
  0xc9   :  { %v99_v16 = vmul.f32 %v1056_v15, %v96_v14 }
  0xca   :  { %v1059_v17 = vpop.f32.mrf.mxu0 }
  0xcb   :  { %v108_v18 = vsel %vm101_vm2, %v99_v16, 0.0  ;;  %v97_v19 = vmul.f32 %v96_v14, %v1059_v17 }
  0xcc   :  { %109 = vadd.xlane.f32.xlu1 %v108_v18  ;;  %v1063_v20 = vpop.f32.mrf.mxu0 }
  0xcd   :  { %872 = vmatpush3.xpose.msk.msra.mxu1 %vm101_vm2, %v1063_v20  ;;  %882 = vmatprep.subr.mxu0 %v1063_v20  ;;  %v102_v21 = vsel %vm101_vm2, %v97_v19, 0.0  ;;  %v100_v22 = vmul.f32 %v1063_v20, %v96_v14 }
  0xce   :  { %103 = vadd.xlane.f32.xlu0 %v102_v21  ;;  %v1070_v23 = vpop.f32.mrf.mxu0  ;;  %883 = vmatpush3.msra.mxu0 %v1063_v20 }
  0xcf   :  { %884 = vmatprep.subr.mxu0 %v1056_v15  ;;  %873 = vmatprep.subr.mxu1 %v986_v9  ;;  %v111_v24 = vsel %vm101_vm2, %v100_v22, 0.0  ;;  %v98_v25 = vmul.f32 %v96_v14, %v1070_v23  ;;  %v429_v14 = vsub.s32 1, %v1044_v11 }
  0xd0   :  { %885 = vmatpush3.msra.mxu0 %v1056_v15  ;;  %112 = vadd.xlane.f32.xlu1 %v111_v24 }
  0xd1   :  { %874 = vmatpush3.xpose.msk.msra.mxu1 %vm101_vm2, %v1056_v15  ;;  %886 = vmatprep.subr.mxu0 %v1070_v23  ;;  %v105_v26 = vsel %vm101_vm2, %v98_v25, 0.0  ;;  %v430_v16 = vrot.slane %v1052_v13, %v429_v14 }
  0xd2   :  { %887 = vmatpush3.msra.mxu0 %v1070_v23  ;;  %106 = vadd.xlane.f32.xlu0 %v105_v26 }
  0xd3   :  { %888 = vmatprep.subr.mxu0 %v1059_v17  ;;  %875 = vmatprep.subr.mxu1 %v986_v9 }
  0xd4   :  { %889 = vmatpush3.msra.mxu0 %v1059_v17 }
  0xd5   :  { %876 = vmatpush3.xpose.msk.msra.mxu1 %vm101_vm2, %v1070_v23  ;;  %896 = vmatprep.subr.mxu0 %v986_v9 }
  0xd6   :  { %877 = vmatprep.subr.mxu1 %v986_v9 }
  0xd9   :  { %878 = vmatpush3.xpose.msk.msra.mxu1 %vm101_vm2, %v1059_v17 }
  0xdc   :  { %880 = vmatmul.mubr.msk.f32.vlgmr.msra.gmra.mxu1 %vm101_vm2, %v1095_v27 }
 0x155   :  { %v110_v28 = vpop.xlane.xlu1 %109 }
 0x157   :  { %v104_v29 = vpop.xlane.xlu0 %103 }
 0x159   :  { %v113_v31 = vpop.xlane.xlu1 %112 }
 0x15b   :  { %v107_v35 = vpop.xlane.xlu0 %106 }
 0x19c   :  { %v195_v30 = vpop.f32.mrf.mxu1 }
 0x19d   :  { %v202_v32 = vrot.slane %v195_v30, %v1047_v12 }
 0x19e   :  { %v881_v36 = vpop.f32.mrf.mxu1 }
 0x19f   :  { %v203_v37 = vadd.f32 %v202_v32, %v104_v29  ;;  %v204_v38 = vadd.f32 %v202_v32, %v107_v35  ;;  %v205_v39 = vadd.f32 %v202_v32, %v110_v28  ;;  %v206_v40 = vadd.f32 %v202_v32, %v113_v31 }
 0x1a1   :  { %vm207_vm5 = vcmp.gt.f32.partialorder %v203_v37, 0.0  ;;  %v211_v43 = vmul.f32 0.2, %v203_v37  ;;  %vm208_vm6 = vcmp.gt.f32.partialorder %v204_v38, 0.0  ;;  %v212_v44 = vmul.f32 0.2, %v204_v38 }
 0x1a2   :  { %vm209_vm7 = vcmp.gt.f32.partialorder %v205_v39, 0.0  ;;  %v213_v45 = vmul.f32 0.2, %v205_v39  ;;  %vm210_vm8 = vcmp.gt.f32.partialorder %v206_v40, 0.0  ;;  %v214_v46 = vmul.f32 0.2, %v206_v40 }
 0x1a3   :  { %v215_v47 = vsel %vm207_vm5, %v203_v37, %v211_v43  ;;  %v216_v48 = vsel %vm208_vm6, %v204_v38, %v212_v44 }
 0x1a4   :  { %v223_v49 = vsel %vm219_vm3, %v215_v47, -1e+30  ;;  %v224_v50 = vsel %vm220_vm4, %v216_v48, -1e+30  ;;  %v217_v51 = vsel %vm209_vm7, %v205_v39, %v213_v45  ;;  %v218_v52 = vsel %vm210_vm8, %v206_v40, %v214_v46 }
 0x1a5   :  { %v227_v53 = vsel %vm101_vm2, %v223_v49, -inf  ;;  %v230_v54 = vsel %vm101_vm2, %v224_v50, -inf  ;;  %v225_v55 = vsel %vm221_vm9, %v217_v51, -1e+30  ;;  %v226_v56 = vsel %vm222_vm10, %v218_v52, -1e+30 }
 0x1a6   :  { %228 = vmax.xlane.f32.xlu0 %v227_v53  ;;  %231 = vmax.xlane.f32.xlu1 %v230_v54  ;;  %v233_v57 = vsel %vm101_vm2, %v225_v55, -inf  ;;  %v236_v58 = vsel %vm101_vm2, %v226_v56, -inf  ;;  %v467_v45 = vrot.slane %v1095_v27, 1  ;;  %vm795_vm7 = vcmask 523520  }
 0x1aa   :  { %234 = vmax.xlane.f32.xlu0 %v233_v57  ;;  %237 = vmax.xlane.f32.xlu1 %v236_v58 }
 0x22f   :  { %v232_v59 = vpop.xlane.xlu1 %231  ;;  %v229_v60 = vpop.xlane.xlu0 %228 }
 0x230   :  { %v240_v61 = vsub.f32 %v224_v50, %v232_v59  ;;  %v239_v62 = vsub.f32 %v223_v49, %v229_v60 }
 0x232   :  { %v245_v63 = vmul.f32 1.442695, %v240_v61  ;;  %v243_v0 = vmul.f32 1.442695, %v239_v62 }
 0x233   :  { %v235_v1 = vpop.xlane.xlu0 %234  ;;  %v238_v18 = vpop.xlane.xlu1 %237 }
 0x234   :  { %928 = vpow2.f32 %v245_v63  ;;  %v241_v2 = vsub.f32 %v225_v55, %v235_v1  ;;  %v242_v19 = vsub.f32 %v226_v56, %v238_v18 }
 0x235   :  { %930 = vpow2.f32 %v243_v0 }
 0x236   :  { %v247_v3 = vmul.f32 1.442695, %v241_v2  ;;  %v249_v21 = vmul.f32 1.442695, %v242_v19 }
 0x238   :  { %932 = vpow2.f32 %v247_v3 }
 0x239   :  { %934 = vpow2.f32 %v249_v21 }
 0x241   :  { %v929_v4 = vpop.eup %928 }
 0x242   :  { %v931_v5 = vpop.eup %930  ;;  %v254_v6 = vsel %vm101_vm2, %v929_v4, 0.0 }
 0x243   :  { %255 = vadd.xlane.f32.xlu1 %v254_v6  ;;  %v251_v7 = vsel %vm101_vm2, %v931_v5, 0.0 }
 0x244   :  { %252 = vadd.xlane.f32.xlu0 %v251_v7 }
 0x245   :  { %v933_v8 = vpop.eup %932 }
 0x246   :  { %v257_v10 = vsel %vm101_vm2, %v933_v8, 0.0  ;;  %v935_v22 = vpop.eup %934 }
 0x247   :  { %v260_v24 = vsel %vm101_vm2, %v935_v22, 0.0 }
 0x248   :  { %258 = vadd.xlane.f32.xlu0 %v257_v10 }
 0x254   :  { %472 = vrot.lane.b32.xlu1 %v1056_v15, %s988_s4 }
 0x258   :  { %470 = vrot.lane.b32.xlu1 %v1070_v23, %s988_s4 }
 0x25e   :  { %474 = vrot.lane.b32.xlu0 %v1063_v20, %s988_s4 }
 0x262   :  { %432 = vrot.lane.b32.xlu0 %v430_v16, %s989_s13 }
 0x27c   :  { %261 = vadd.xlane.f32.xlu1 %v260_v24 }
 0x28d   :  { %468 = vrot.lane.b32.xlu1 %v1059_v17, %s988_s4 }
 0x2cc   :  { %v256_v11 = vpop.xlane.xlu1 %255 }
 0x2cd   :  { %936 = vrcp.f32 %v256_v11  ;;  %v253_v25 = vpop.xlane.xlu0 %252 }
 0x2ce   :  { %938 = vrcp.f32 %v253_v25 }
 0x2d0   :  { %v473_v13 = vpop.permute.xlu1 %472 }
 0x2d1   :  { %v259_v26 = vpop.xlane.xlu0 %258 }
 0x2d2   :  { %940 = vrcp.f32 %v259_v26 }
 0x2d4   :  { %v471_v29 = vpop.permute.xlu1 %470 }
 0x2d5   :  { %v475_v28 = vpop.permute.xlu0 %474 }
 0x2d6   :  { %907 = vmatprep.subr.mxu1 %v475_v28 }
 0x2d7   :  { %908 = vmatpush3.msra.mxu1 %v475_v28 }
 0x2d8   :  { %909 = vmatprep.subr.mxu1 %v473_v13 }
 0x2d9   :  { %910 = vmatpush3.msra.mxu1 %v473_v13  ;;  %v433_v30 = vpop.permute.xlu0 %432 }
 0x2da   :  { %v937_v31 = vpop.eup %936  ;;  %911 = vmatprep.subr.mxu1 %v471_v29  ;;  %v436_v32 = vmul.f32 %v433_v30, %v1070_v23  ;;  %v435_v35 = vmul.f32 %v433_v30, %v1059_v17  ;;  %v438_v39 = vmul.f32 %v1063_v20, %v433_v30  ;;  %v437_v43 = vmul.f32 %v1056_v15, %v433_v30 }
 0x2db   :  { %v939_v36 = vpop.eup %938  ;;  %912 = vmatpush3.msra.mxu1 %v471_v29  ;;  %v266_v37 = vmul.f32 %v937_v31, %v929_v4 }
 0x2dc   :  { %445 = vrot.lane.b32.xlu0 %v436_v32, %s988_s4  ;;  %443 = vrot.lane.b32.xlu1 %v435_v35, %s988_s4  ;;  %v264_v38 = vmul.f32 %v939_v36, %v931_v5 }
 0x2de   :  { %890 = vmatprep.mubr.msk.f32.mxu0 %vm101_vm2, %v264_v38 }
 0x2df   :  { %v941_v40 = vpop.eup %940  ;;  %891 = vmatmul.mubr.msk.f32.vlgmr.msra.gmra.mxu0 %vm101_vm2, %v266_v37 }
 0x2e0   :  { %897 = vmatpush3.xpose.msk.msra.mxu0 %vm101_vm2, %v475_v28  ;;  %449 = vrot.lane.b32.xlu0 %v438_v39, %s988_s4  ;;  %v268_v17 = vmul.f32 %v941_v40, %v933_v8 }
 0x2e1   :  { %447 = vrot.lane.b32.xlu1 %v437_v43, %s988_s4  ;;  %898 = vmatprep.subr.mxu0 %v986_v9 }
 0x2e2   :  { %893 = vmatprep.mubr.msk.f32.mxu0 %vm101_vm2, %v268_v17 }
 0x2e4   :  { %899 = vmatpush3.xpose.msk.msra.mxu0 %vm101_vm2, %v473_v13 }
 0x2e5   :  { %900 = vmatprep.subr.mxu0 %v986_v9 }
 0x2e8   :  { %901 = vmatpush3.xpose.msk.msra.mxu0 %vm101_vm2, %v471_v29 }
 0x2e9   :  { %902 = vmatprep.subr.mxu0 %v986_v9 }
 0x305   :  { %v262_v15 = vpop.xlane.xlu1 %261 }
 0x306   :  { %942 = vrcp.f32 %v262_v15 }
 0x309   :  { %v469_v20 = vpop.permute.xlu1 %468 }
 0x30a   :  { %903 = vmatpush3.xpose.msk.msra.mxu0 %vm101_vm2, %v469_v20  ;;  %913 = vmatprep.subr.mxu1 %v469_v20 }
 0x30b   :  { %914 = vmatpush3.msra.mxu1 %v469_v20 }
 0x313   :  { %v943_v23 = vpop.eup %942 }
 0x314   :  { %v270_v44 = vmul.f32 %v943_v23, %v935_v22 }
 0x316   :  { %894 = vmatmul.mubr.msk.f32.gmra.mxu0 %vm101_vm2, %v270_v44 }
 0x317   :  { %904 = vmatprep.mubr.msk.f32.mxu0 %vm987_vm1, %v986_v9 }
 0x31a   :  { %905 = vmatmul.mubr.msk.f32.vlgmr.msra.gmra.mxu0 %vm101_vm2, %v467_v45 }
 0x34e   :  { %v446_v46 = vpop.permute.xlu0 %445  ;;  %v444_v47 = vpop.permute.xlu1 %443 }
 0x34f   :  { %v458_v48 = vsel %vm101_vm2, %v446_v46, 0.0  ;;  %v455_v49 = vsel %vm101_vm2, %v444_v47, 0.0 }
 0x350   :  { %459 = vadd.xlane.f32.xlu0 %v458_v48  ;;  %456 = vadd.xlane.f32.xlu1 %v455_v49 }
 0x352   :  { %v450_v52 = vpop.permute.xlu0 %449 }
 0x353   :  { %v448_v50 = vpop.permute.xlu1 %447  ;;  %v464_v27 = vsel %vm101_vm2, %v450_v52, 0.0 }
 0x354   :  { %v461_v51 = vsel %vm101_vm2, %v448_v50, 0.0 }
 0x355   :  { %462 = vadd.xlane.f32.xlu0 %v461_v51 }
 0x359   :  { %465 = vadd.xlane.f32.xlu0 %v464_v27 }
 0x39f   :  { %v892_v53 = vpop.f32.mrf.mxu0 }
 0x3a0   :  { %v369_v56 = vsel %vm101_vm2, %v892_v53, 0.0 }
 0x3a1   :  { %v349_v9 = vpop.f32.mrf.mxu0 }
 0x3a2   :  { %v368_v54 = vsel %vm101_vm2, %v349_v9, 0.0 }
 0x3a3   :  { %v370_v57 = vadd.f32 %v369_v56, %v368_v54 }
 0x3d6   :  { %v895_v55 = vpop.f32.mrf.mxu0 }
 0x3d7   :  { %v373_v63 = vsel %vm101_vm2, %v895_v55, 0.0 }
 0x3d8   :  { %v359_v58 = vpop.f32.mrf.mxu0 }
 0x3d9   :  { %v371_v59 = vsel %vm101_vm2, %v359_v58, 0.0  ;;  %v460_v60 = vpop.xlane.xlu0 %459  ;;  %v457_v2 = vpop.xlane.xlu1 %456 }
 0x3da   :  { %v372_v61 = vadd.f32 %v371_v59, %v370_v57  ;;  %v552_v62 = vpop.f32.mrf.mxu0 }
 0x3db   :  { %v559_v0 = vrot.slane %v552_v62, %v1047_v12 }
 0x3dc   :  { %v374_v1 = vadd.f32 %v373_v63, %v372_v61  ;;  %v906_v3 = vpop.f32.mrf.mxu0 }
 0x3dd   :  { %v561_v4 = vadd.f32 %v559_v0, %v460_v60  ;;  %v560_v5 = vadd.f32 %v559_v0, %v457_v2 }
 0x3de   :  { %v375_v6 = vrot.slane %v374_v1, 4  ;;  %v463_v7 = vpop.xlane.xlu0 %462 }
 0x3df   :  { %v562_v8 = vadd.f32 %v559_v0, %v463_v7  ;;  %vm565_vm11 = vcmp.gt.f32.partialorder %v561_v4, 0.0  ;;  %v569_v10 = vmul.f32 0.2, %v561_v4  ;;  %vm564_vm12 = vcmp.gt.f32.partialorder %v560_v5, 0.0 }
 0x3e0   :  { %v376_v14 = vadd.f32 %v375_v6, %v374_v1  ;;  %v568_v16 = vmul.f32 0.2, %v560_v5 }
 0x3e1   :  { %v570_v18 = vmul.f32 0.2, %v562_v8  ;;  %v573_v19 = vsel %vm565_vm11, %v561_v4, %v569_v10  ;;  %vm566_vm13 = vcmp.gt.f32.partialorder %v562_v8, 0.0 }
 0x3e2   :  { %v377_v21 = vrot.slane %v376_v14, 2  ;;  %v466_v22 = vpop.xlane.xlu0 %465  ;;  %v1185_v12 = vsel %vm220_vm4, %v573_v19, -1e+30  ;;  %v572_v24 = vsel %vm564_vm12, %v560_v5, %v568_v16 }
 0x3e3   :  { %v563_v11 = vadd.f32 %v559_v0, %v466_v22  ;;  %v583_v25 = vsel %vm101_vm2, %v1185_v12, -inf  ;;  %v1191_v26 = vsel %vm219_vm3, %v572_v24, -1e+30  ;;  %v574_v13 = vsel %vm566_vm13, %v562_v8, %v570_v18 }
 0x3e4   :  { %v378_v28 = vadd.f32 %v377_v21, %v376_v14  ;;  %584 = vmax.xlane.f32.xlu0 %v583_v25  ;;  %v580_v29 = vsel %vm101_vm2, %v1191_v26, -inf  ;;  %v1197_v34 = vsel %vm221_vm9, %v574_v13, -1e+30 }
 0x3e5   :  { %v571_v30 = vmul.f32 0.2, %v563_v11  ;;  %581 = vmax.xlane.f32.xlu1 %v580_v29  ;;  %vm567_vm14 = vcmp.gt.f32.partialorder %v563_v11, 0.0  ;;  %v586_v36 = vsel %vm101_vm2, %v1197_v34, -inf }
 0x3e6   :  { %v379_v31 = vrot.slane %v378_v28, 1 }
 0x3e7   :  { %v575_v32 = vsel %vm567_vm14, %v563_v11, %v571_v30 }
 0x3e8   :  { %v380_v35 = vadd.f32 %v379_v31, %v378_v28  ;;  %v1201_v33 = vsel %vm222_vm10, %v575_v32, -1e+30 }
 0x3e9   :  { %v589_v37 = vsel %vm101_vm2, %v1201_v33, -inf  ;;  %587 = vmax.xlane.f32.xlu1 %v586_v36 }
 0x3ea   :  { %v382_v38 = vmul.f32 0.03125, %v380_v35  ;;  %590 = vmax.xlane.f32.xlu0 %v589_v37 }
 0x3ec   :  { %v383_v39 = vsub.f32 %v349_v9, %v382_v38  ;;  %v384_v41 = vsub.f32 %v892_v53, %v382_v38  ;;  %v385_v40 = vsub.f32 %v359_v58, %v382_v38  ;;  %v386_v43 = vsub.f32 %v895_v55, %v382_v38 }
 0x3ee   :  { %v387_v17 = vmul.f32 %v383_v39, %v383_v39  ;;  %v388_v15 = vmul.f32 %v384_v41, %v384_v41  ;;  %v389_v20 = vmul.f32 %v385_v40, %v385_v40  ;;  %v390_v23 = vmul.f32 %v386_v43, %v386_v43 }
 0x3f0   :  { %v391_v42 = vsel %vm101_vm2, %v387_v17, 0.0  ;;  %v392_v44 = vsel %vm101_vm2, %v388_v15, 0.0  ;;  %v394_v46 = vsel %vm101_vm2, %v389_v20, 0.0  ;;  %v396_v48 = vsel %vm101_vm2, %v390_v23, 0.0 }
 0x3f1   :  { %v393_v45 = vadd.f32 %v392_v44, %v391_v42 }
 0x3f3   :  { %v395_v47 = vadd.f32 %v394_v46, %v393_v45 }
 0x3f5   :  { %v397_v49 = vadd.f32 %v396_v48, %v395_v47 }
 0x3f7   :  { %v398_v50 = vrot.slane %v397_v49, 4 }
 0x3f9   :  { %v399_v51 = vadd.f32 %v398_v50, %v397_v49 }
 0x3fb   :  { %v400_v52 = vrot.slane %v399_v51, 2 }
 0x3fd   :  { %v401_v27 = vadd.f32 %v400_v52, %v399_v51 }
 0x3ff   :  { %v402_v53 = vrot.slane %v401_v27, 1 }
 0x401   :  { %v403_v9 = vadd.f32 %v402_v53, %v401_v27 }
 0x403   :  { %v404_v54 = vmul.f32 0.03125, %v403_v9 }
 0x405   :  { %v405_v55 = vadd.f32 1e-05, %v404_v54 }
 0x407   :  { %944 = vrsqrt.f32 %v405_v55 }
 0x414   :  { %v945_v56 = vpop.eup %944 }
 0x415   :  { %v409_v57 = vmul.f32 %v945_v56, %v385_v40  ;;  %v408_v58 = vmul.f32 %v945_v56, %v384_v41  ;;  %v407_v59 = vmul.f32 %v945_v56, %v383_v39  ;;  %v410_v60 = vmul.f32 %v945_v56, %v386_v43 }
 0x417   :  { %v417_v61 = vmul.f32 0.01, %v409_v57  ;;  %vm412_vm15 = vcmp.gt.f32.partialorder %v408_v58, 0.0  ;;  %v416_v62 = vmul.f32 0.01, %v408_v58  ;;  %vm411_vm0 = vcmp.gt.f32.partialorder %v407_v59, 0.0 }
 0x418   :  { %v415_v63 = vmul.f32 0.01, %v407_v59  ;;  %vm413_vm1 = vcmp.gt.f32.partialorder %v409_v57, 0.0  ;;  %vm414_vm3 = vcmp.gt.f32.partialorder %v410_v60, 0.0  ;;  %v418_v0 = vmul.f32 0.01, %v410_v60 }
 0x419   :  { %v420_v1 = vsel %vm412_vm15, %v408_v58, %v416_v62  ;;  %v421_v2 = vsel %vm413_vm1, %v409_v57, %v417_v61 }
 0x41a   :  { %424 = vst.msk [vmem:[#allocation2 + $0x8] sm:$0xff] %vm101_vm2, %v420_v1  ;;  %v419_v3 = vsel %vm411_vm0, %v407_v59, %v415_v63  ;;  %425 = vst.msk [vmem:[#allocation2 + $0x10] sm:$0xff] %vm101_vm2, %v421_v2  ;;  %v422_v4 = vsel %vm414_vm3, %v410_v60, %v418_v0 }
 0x41b   :  { %423 = vst.msk [vmem:[#allocation2] sm:$0xff] %vm101_vm2, %v419_v3  ;;  %426 = vst.msk [vmem:[#allocation2 + $0x18] sm:$0xff] %vm101_vm2, %v422_v4 }
 0x46d   :  { %v585_v5 = vpop.xlane.xlu0 %584 }
 0x46e   :  { %v593_v6 = vsub.f32 %v1185_v12, %v585_v5  ;;  %v582_v7 = vpop.xlane.xlu1 %581 }
 0x46f   :  { %v592_v8 = vsub.f32 %v1191_v26, %v582_v7 }
 0x470   :  { %v598_v10 = vmul.f32 1.442695, %v593_v6 }
 0x471   :  { %v596_v14 = vmul.f32 1.442695, %v592_v8 }
 0x472   :  { %946 = vpow2.f32 %v598_v10  ;;  %v588_v16 = vpop.xlane.xlu1 %587 }
 0x473   :  { %948 = vpow2.f32 %v596_v14  ;;  %v591_v18 = vpop.xlane.xlu0 %590  ;;  %v594_v19 = vsub.f32 %v1197_v34, %v588_v16 }
 0x474   :  { %v595_v21 = vsub.f32 %v1201_v33, %v591_v18 }
 0x475   :  { %v600_v22 = vmul.f32 1.442695, %v594_v19 }
 0x476   :  { %v602_v24 = vmul.f32 1.442695, %v595_v21 }
 0x477   :  { %950 = vpow2.f32 %v600_v22 }
 0x478   :  { %952 = vpow2.f32 %v602_v24 }
 0x47f   :  { %v947_v11 = vpop.eup %946 }
 0x480   :  { %v949_v25 = vpop.eup %948  ;;  %v607_v12 = vsel %vm101_vm2, %v947_v11, 0.0 }
 0x481   :  { %608 = vadd.xlane.f32.xlu0 %v607_v12  ;;  %v604_v26 = vsel %vm101_vm2, %v949_v25, 0.0 }
 0x482   :  { %605 = vadd.xlane.f32.xlu1 %v604_v26 }
 0x484   :  { %v951_v13 = vpop.eup %950 }
 0x485   :  { %v953_v28 = vpop.eup %952  ;;  %v610_v29 = vsel %vm101_vm2, %v951_v13, 0.0 }
 0x486   :  { %v613_v30 = vsel %vm101_vm2, %v953_v28, 0.0  ;;  %611 = vadd.xlane.f32.xlu1 %v610_v29 }
 0x487   :  { %614 = vadd.xlane.f32.xlu0 %v613_v30 }
 0x50a   :  { %v609_v34 = vpop.xlane.xlu0 %608 }
 0x50b   :  { %954 = vrcp.f32 %v609_v34  ;;  %v606_v31 = vpop.xlane.xlu1 %605 }
 0x50c   :  { %956 = vrcp.f32 %v606_v31 }
 0x50f   :  { %v612_v32 = vpop.xlane.xlu1 %611 }
 0x510   :  { %v615_v35 = vpop.xlane.xlu0 %614  ;;  %958 = vrcp.f32 %v612_v32 }
 0x511   :  { %960 = vrcp.f32 %v615_v35 }
 0x518   :  { %v955_v33 = vpop.eup %954 }
 0x519   :  { %v957_v36 = vpop.eup %956  ;;  %v619_v37 = vmul.f32 %v955_v33, %v947_v11 }
 0x51a   :  { %v617_v38 = vmul.f32 %v957_v36, %v949_v25 }
 0x51c   :  { %915 = vmatprep.mubr.msk.f32.mxu1 %vm101_vm2, %v617_v38 }
 0x51d   :  { %v959_v39 = vpop.eup %958  ;;  %916 = vmatmul.mubr.msk.f32.vlgmr.msra.gmra.mxu1 %vm101_vm2, %v619_v37 }
 0x51e   :  { %v961_v41 = vpop.eup %960  ;;  %v621_v40 = vmul.f32 %v959_v39, %v951_v13 }
 0x51f   :  { %v623_v43 = vmul.f32 %v961_v41, %v953_v28 }
 0x520   :  { %918 = vmatprep.mubr.msk.f32.mxu1 %vm101_vm2, %v621_v40 }
 0x521   :  { %919 = vmatmul.mubr.msk.f32.gmra.mxu1 %vm101_vm2, %v623_v43 }
 0x5dd   :  { %v917_v17 = vpop.f32.mrf.mxu1 }
 0x5de   :  { %v726_v42 = vsel %vm101_vm2, %v917_v17, 0.0 }
 0x5df   :  { %v706_v15 = vpop.f32.mrf.mxu1 }
 0x5e0   :  { %v725_v20 = vsel %vm101_vm2, %v706_v15, 0.0 }
 0x5e1   :  { %v920_v23 = vpop.f32.mrf.mxu1  ;;  %v727_v44 = vadd.f32 %v726_v42, %v725_v20 }
 0x5e2   :  { %v730_v48 = vsel %vm101_vm2, %v920_v23, 0.0 }
 0x5e3   :  { %v716_v45 = vpop.f32.mrf.mxu1 }
 0x5e4   :  { %v728_v46 = vsel %vm101_vm2, %v716_v45, 0.0 }
 0x5e5   :  { %v729_v47 = vadd.f32 %v728_v46, %v727_v44 }
 0x5e7   :  { %v731_v49 = vadd.f32 %v730_v48, %v729_v47 }
 0x5e9   :  { %v732_v50 = vrot.slane %v731_v49, 4 }
 0x5eb   :  { %v733_v51 = vadd.f32 %v732_v50, %v731_v49 }
 0x5ed   :  { %v734_v52 = vrot.slane %v733_v51, 2 }
 0x5ef   :  { %v735_v27 = vadd.f32 %v734_v52, %v733_v51 }
 0x5f1   :  { %v736_v53 = vrot.slane %v735_v27, 1 }
 0x5f3   :  { %v737_v9 = vadd.f32 %v736_v53, %v735_v27 }
 0x5f5   :  { %v738_v54 = vmul.f32 0.03125, %v737_v9 }
 0x5f7   :  { %v739_v55 = vsub.f32 %v706_v15, %v738_v54  ;;  %v740_v56 = vsub.f32 %v917_v17, %v738_v54  ;;  %v741_v57 = vsub.f32 %v716_v45, %v738_v54  ;;  %v742_v58 = vsub.f32 %v920_v23, %v738_v54 }
 0x5f9   :  { %v743_v59 = vmul.f32 %v739_v55, %v739_v55  ;;  %v744_v60 = vmul.f32 %v740_v56, %v740_v56  ;;  %v745_v61 = vmul.f32 %v741_v57, %v741_v57  ;;  %v746_v62 = vmul.f32 %v742_v58, %v742_v58 }
 0x5fb   :  { %v747_v63 = vsel %vm101_vm2, %v743_v59, 0.0  ;;  %v748_v0 = vsel %vm101_vm2, %v744_v60, 0.0  ;;  %v750_v2 = vsel %vm101_vm2, %v745_v61, 0.0  ;;  %v752_v4 = vsel %vm101_vm2, %v746_v62, 0.0 }
 0x5fc   :  { %v749_v1 = vadd.f32 %v748_v0, %v747_v63 }
 0x5fe   :  { %v751_v3 = vadd.f32 %v750_v2, %v749_v1 }
 0x600   :  { %v753_v5 = vadd.f32 %v752_v4, %v751_v3 }
 0x602   :  { %v754_v6 = vrot.slane %v753_v5, 4 }
 0x604   :  { %v755_v7 = vadd.f32 %v754_v6, %v753_v5 }
 0x606   :  { %v756_v8 = vrot.slane %v755_v7, 2 }
 0x608   :  { %v757_v10 = vadd.f32 %v756_v8, %v755_v7 }
 0x60a   :  { %v758_v14 = vrot.slane %v757_v10, 1 }
 0x60c   :  { %v759_v16 = vadd.f32 %v758_v14, %v757_v10 }
 0x60e   :  { %v760_v18 = vmul.f32 0.03125, %v759_v16 }
 0x610   :  { %v761_v19 = vadd.f32 1e-05, %v760_v18 }
 0x612   :  { %962 = vrsqrt.f32 %v761_v19 }
 0x61f   :  { %v963_v21 = vpop.eup %962 }
 0x620   :  { %v765_v22 = vmul.f32 %v963_v21, %v741_v57  ;;  %v764_v24 = vmul.f32 %v963_v21, %v740_v56  ;;  %v763_v11 = vmul.f32 %v963_v21, %v739_v55  ;;  %v766_v29 = vmul.f32 %v963_v21, %v742_v58 }
 0x622   :  { %vm768_vm4 = vcmp.gt.f32.partialorder %v764_v24, 0.0  ;;  %v772_v25 = vmul.f32 0.01, %v764_v24  ;;  %vm767_vm5 = vcmp.gt.f32.partialorder %v763_v11, 0.0  ;;  %v771_v12 = vmul.f32 0.01, %v763_v11 }
 0x623   :  { %v773_v28 = vmul.f32 0.01, %v765_v22  ;;  %vm769_vm2 = vcmp.gt.f32.partialorder %v765_v22, 0.0  ;;  %v774_v34 = vmul.f32 0.01, %v766_v29  ;;  %vm770_vm6 = vcmp.gt.f32.partialorder %v766_v29, 0.0 }
 0x624   :  { %v776_v26 = vsel %vm768_vm4, %v764_v24, %v772_v25  ;;  %v775_v13 = vsel %vm767_vm5, %v763_v11, %v771_v12 }
 0x625   :  { %785 = vrot.lane.b32.xlu0 %v776_v26, %s989_s13  ;;  %783 = vrot.lane.b32.xlu1 %v775_v13, %s989_s13  ;;  %v777_v30 = vsel %vm769_vm2, %v765_v22, %v773_v28  ;;  %v778_v31 = vsel %vm770_vm6, %v766_v29, %v774_v34 }
 0x629   :  { %787 = vrot.lane.b32.xlu1 %v777_v30, %s989_s13 }
 0x62d   :  { %789 = vrot.lane.b32.xlu1 %v778_v31, %s989_s13 }
 0x697   :  { %v786_v32 = vpop.permute.xlu0 %785  ;;  %v784_v35 = vpop.permute.xlu1 %783 }
 0x698   :  { %797 = vst.msk [vmem:[#allocation2 + $0x8] sm:$0xff] %vm795_vm7, %v786_v32  ;;  %796 = vst.msk [vmem:[#allocation2] sm:$0xff] %vm795_vm7, %v784_v35 }
 0x69b   :  { %v788_v33 = vpop.permute.xlu1 %787 }
 0x69c   :  { %798 = vst.msk [vmem:[#allocation2 + $0x10] sm:$0xff] %vm795_vm7, %v788_v33 }
 0x69f   :  { %v790_v36 = vpop.permute.xlu1 %789 }
 0x6a0   :  { %799 = vst.msk [vmem:[#allocation2 + $0x18] sm:$0xff] %vm795_vm7, %v790_v36 }
 0x6a1   :  { %975 = shalt.err (!%p972_p4)
}
 0x6a2   :  { %s991_s17 = smov 128   ;;  %s992_s18 = smov 8  }
 0x6a3   :  { %811 = dma.vmem_to_hbm [thread:$0]  %s806_s15, 512, %s1247_s5, [#allocation3], %s991_s17, %s991_s17, %s992_s18  }
 0x6a4   :  { %984 = dma.done.wait [#allocation3], 512  }
 0x6a5   :  { %985 = vsyncadd [#allocation3], 4294966784 }
 0x6a6   :  { %815 = vsyncpa [#allocation3], 1 }

</bundles_post_ra>
